<compile_context>
chip_gen: v7x
topology: tpu7x:2x2x1
jax: 0.10.0
libtpu: 0.0.40
codegen_flags: <defaults>
</compile_context>

<pallas_src>
import numpy as np
import jax
import jax.numpy as jnp
from jax.experimental import pallas as pl
from jax.experimental.pallas import tpu as pltpu

CONTEXT_LENGTH = 10
SEQ = CONTEXT_LENGTH - 1            # 9   (input sequence length)
CONV_OUT_CH = 32
CONV_K = 3
CONV_OUT_LEN = SEQ - CONV_K + 1     # 7   (== context_length - 3)
FLAT = CONV_OUT_CH * CONV_OUT_LEN   # 224
HID = 64


def _round_up(x, m):
    return (x + m - 1) // m * m


# ----------------------------------------------------------------------------- kernel
def stock_predictor_kernel(x_ref, mT_ref, bconv_ref, w1_ref, b1_ref,
                           w2_ref, b2_ref, o_ref):
    x = x_ref[...]                                                     # (SEQ, TB) bf16
    # Conv1d(valid, k=3) as Toeplitz matmul: (FLAT, SEQ) @ (SEQ, TB) -> (FLAT, TB)
    conv = jnp.dot(mT_ref[...], x, preferred_element_type=jnp.float32)
    h0 = jnp.maximum(conv + bconv_ref[...], 0.0)                       # f32, ReLU
    # fc1: (HID, FLAT) @ (FLAT, TB) -> (HID, TB)
    h1 = jnp.dot(w1_ref[...], h0.astype(jnp.bfloat16),
                 preferred_element_type=jnp.float32)
    h1 = jnp.maximum(h1 + b1_ref[...], 0.0)
    # fc2: (1, HID) @ (HID, TB) -> (1, TB)   (lane-dense output tile)
    out = jnp.dot(w2_ref[...], h1.astype(jnp.bfloat16),
                  preferred_element_type=jnp.float32)
    o_ref[...] = (out + b2_ref[...]).astype(o_ref.dtype)


# ------------------------------------------------------------------- parameter prep
def make_params(key):
    """Deterministic PyTorch-default-style init (uniform +/- 1/sqrt(fan_in))."""
    ks = jax.random.split(key, 6)

    def u(k, shape, fan_in):
        bound = 1.0 / np.sqrt(fan_in)
        return jax.random.uniform(k, shape, jnp.float32, -bound, bound)

    w_conv = u(ks[0], (CONV_OUT_CH, 1, CONV_K), 1 * CONV_K)   # (O, I, K)
    b_conv = u(ks[1], (CONV_OUT_CH,), 1 * CONV_K)
    w_fc1 = u(ks[2], (HID, FLAT), FLAT)                       # (out, in)
    b_fc1 = u(ks[3], (HID,), FLAT)
    w_fc2 = u(ks[4], (1, HID), HID)
    b_fc2 = u(ks[5], (1,), HID)
    return w_conv, b_conv, w_fc1, b_fc1, w_fc2, b_fc2


def conv_weight_to_toeplitz_T(w_conv):
    """Expand Conv1d weight (O,1,K) -> (O*L, SEQ); row c*L+p, col s holds w[c, s-p]."""
    w = jnp.asarray(w_conv, jnp.float32).reshape(CONV_OUT_CH, CONV_K)     # (O, K)
    p = jnp.arange(CONV_OUT_LEN)
    s = jnp.arange(SEQ)
    col = s[None, :] - p[:, None]                                         # (L, SEQ)
    mask = (col >= 0) & (col < CONV_K)
    col_clipped = jnp.clip(col, 0, CONV_K - 1)
    block = jnp.where(mask[None, :, :], w[:, col_clipped], 0.0)           # (O, L, SEQ)
    return block.reshape(FLAT, SEQ)


def prepare_params(params):
    """One-time (cacheable) expansion/cast of torch-layout params for the kernel."""
    w_conv, b_conv, w_fc1, b_fc1, w_fc2, b_fc2 = params
    mT = conv_weight_to_toeplitz_T(w_conv).astype(jnp.bfloat16)         # (224, 9)
    bconv = jnp.repeat(b_conv.astype(jnp.float32),
                       CONV_OUT_LEN).reshape(FLAT, 1)                   # (224, 1)
    w1 = w_fc1.astype(jnp.bfloat16)                                     # (64, 224)
    b1 = b_fc1.astype(jnp.float32).reshape(HID, 1)                      # (64, 1)
    w2 = w_fc2.astype(jnp.bfloat16)                                     # (1, 64)
    b2 = b_fc2.astype(jnp.float32).reshape(1, 1)                        # (1, 1)
    return mT, bconv, w1, b1, w2, b2


# ------------------------------------------------------------------------ forward
def stock_predictor_forward(x, prepared):
    mT, bconv, w1, b1, w2, b2 = prepared
    B = x.shape[0]

    # Lane-dense batch tile; weights + activations are tiny, so a big tile amortizes
    # the per-grid-step overhead while staying far under the VMEM limit.
    tile_b = min(1024, _round_up(B, 128))
    b_pad = _round_up(B, tile_b)
    n_tiles = b_pad // tile_b

    x_t = x.astype(jnp.bfloat16).T                # (SEQ, B): batch on lanes
    if b_pad != B:
        x_t = jnp.pad(x_t, ((0, 0), (0, b_pad - B)))

    grid_spec = pltpu.PrefetchScalarGridSpec(
        num_scalar_prefetch=0,
        grid=(n_tiles,),
        in_specs=[
            pl.BlockSpec((SEQ, tile_b), lambda i: (0, i)),       # x tile (pipelined)
            pl.BlockSpec(mT.shape, lambda i: (0, 0)),            # weights stay resident
            pl.BlockSpec(bconv.shape, lambda i: (0, 0)),
            pl.BlockSpec(w1.shape, lambda i: (0, 0)),
            pl.BlockSpec(b1.shape, lambda i: (0, 0)),
            pl.BlockSpec(w2.shape, lambda i: (0, 0)),
            pl.BlockSpec(b2.shape, lambda i: (0, 0)),
        ],
        out_specs=pl.BlockSpec((1, tile_b), lambda i: (0, i)),
    )

    out_t = pl.pallas_call(
        stock_predictor_kernel,
        grid_spec=grid_spec,
        out_shape=jax.ShapeDtypeStruct((1, b_pad), jnp.float32),
        compiler_params=pltpu.CompilerParams(
            dimension_semantics=("parallel",)),
    )(x_t, mT, bconv, w1, b1, w2, b2)

    return out_t[:, :B].T                          # (B, 1), matches PyTorch output


stock_predictor_forward_jit = jax.jit(stock_predictor_forward)


# ---------------------------------------------------------------------- references
def reference_forward(x, params):
    """Pure-JAX f32 reference mirroring the PyTorch forward exactly."""
    w_conv, b_conv, w_fc1, b_fc1, w_fc2, b_fc2 = params
    B, S = x.shape
    xi = x.reshape(B, 1, S)
    conv = jax.lax.conv_general_dilated(
        xi, w_conv, window_strides=(1,), padding="VALID",
        dimension_numbers=("NCH", "OIH", "NCH"))
    conv = conv + b_conv.reshape(1, -1, 1)
    h0 = jnp.maximum(conv, 0.0).reshape(B, -1)      # same flatten order as torch view
    h1 = jnp.maximum(h0 @ w_fc1.T + b_fc1, 0.0)
    return h1 @ w_fc2.T + b_fc2


def reference_forward_bf16(x, prepared):
    """Pure-JAX reference of the exact kernel math (bf16 operands, f32 accumulate)."""
    mT, bconv, w1, b1, w2, b2 = prepared
    xb = x.astype(jnp.bfloat16).T
    conv = jnp.dot(mT, xb, preferred_element_type=jnp.float32) + bconv
    h0 = jnp.maximum(conv, 0.0)
    h1 = jnp.dot(w1, h0.astype(jnp.bfloat16),
                 preferred_element_type=jnp.float32) + b1
    h1 = jnp.maximum(h1, 0.0)
    out = jnp.dot(w2, h1.astype(jnp.bfloat16),
                  preferred_element_type=jnp.float32) + b2
    return out.T


# ---------------------------------------------------------------------------- main
if __name__ == "__main__":
    key = jax.random.PRNGKey(0)
    pkey, xkey = jax.random.split(key)
    params = make_params(pkey)
    prepared = prepare_params(params)               # hoisted: expand/cast weights once

    batch = 4                                       # settings['batch_size']
    x = jax.random.uniform(xkey, (batch, SEQ), jnp.float32)   # (4, 9)

    out = stock_predictor_forward_jit(x, prepared)
    out = jax.block_until_ready(out)

    # tight check vs a pure-JAX replica of the kernel math (bf16 operands)
    ref_bf16 = jax.block_until_ready(reference_forward_bf16(x, prepared))
    np.testing.assert_allclose(np.asarray(out), np.asarray(ref_bf16),
                               rtol=2e-3, atol=2e-3)

    # semantic check vs the f32 PyTorch-equivalent forward (bf16 matmul tolerance)
    ref_f32 = jax.block_until_ready(reference_forward(x, params))
    np.testing.assert_allclose(np.asarray(out), np.asarray(ref_f32),
                               rtol=5e-2, atol=5e-2)

    print("KERNEL_OK")
</pallas_src>

<mosaic_0001>
module attributes {stable_mosaic.version = 11 : i64} {
  func.func @stock_predictor_kernel(%arg0: i32, %arg1: memref<9x128xbf16, #tpu.memory_space<vmem>>, %arg2: memref<224x9xbf16, #tpu.memory_space<vmem>>, %arg3: memref<224x1xf32, #tpu.memory_space<vmem>>, %arg4: memref<64x224xbf16, #tpu.memory_space<vmem>>, %arg5: memref<64x1xf32, #tpu.memory_space<vmem>>, %arg6: memref<1x64xbf16, #tpu.memory_space<vmem>>, %arg7: memref<1x1xf32, #tpu.memory_space<vmem>>, %arg8: memref<1x128xf32, #tpu.memory_space<vmem>>) attributes {dimension_semantics = [#tpu.dimension_semantics<parallel>], iteration_bounds = array<i64: 1>, scalar_prefetch = 0 : i64, scratch_operands = 0 : i64, tpu.core_type = #tpu.core_type<tc>, window_params = [{transform_indices = @transform_0, window_bounds = array<i64: 9, 128>}, {pipeline_mode = #tpu.pipeline_mode<synchronous>, transform_indices = @transform_1, window_bounds = array<i64: 224, 9>}, {pipeline_mode = #tpu.pipeline_mode<synchronous>, transform_indices = @transform_2, window_bounds = array<i64: 224, 1>}, {pipeline_mode = #tpu.pipeline_mode<synchronous>, transform_indices = @transform_3, window_bounds = array<i64: 64, 224>}, {pipeline_mode = #tpu.pipeline_mode<synchronous>, transform_indices = @transform_4, window_bounds = array<i64: 64, 1>}, {pipeline_mode = #tpu.pipeline_mode<synchronous>, transform_indices = @transform_5, window_bounds = array<i64: 1, 64>}, {pipeline_mode = #tpu.pipeline_mode<synchronous>, transform_indices = @transform_6, window_bounds = array<i64: 1, 1>}, {transform_indices = @transform_7, window_bounds = array<i64: 1, 128>}]} {
    %c0 = arith.constant 0 : index
    %c0_0 = arith.constant 0 : index
    %0 = vector.load %arg1[%c0, %c0_0] : memref<9x128xbf16, #tpu.memory_space<vmem>>, vector<9x128xbf16>
    %c0_1 = arith.constant 0 : index
    %c0_2 = arith.constant 0 : index
    %1 = vector.load %arg2[%c0_1, %c0_2] : memref<224x9xbf16, #tpu.memory_space<vmem>>, vector<224x9xbf16>
    %cst = arith.constant dense<0.000000e+00> : vector<224x128xf32>
    %2 = tpu.matmul %1, %0, %cst {dimension_numbers = #tpu.dot_dimension_numbers<[1], [0], [0], [1], [0, 0, 1, 1], [], []>} : vector<224x9xbf16>, vector<9x128xbf16>, vector<224x128xf32> -> vector<224x128xf32>
    %c0_3 = arith.constant 0 : index
    %c0_4 = arith.constant 0 : index
    %3 = vector.load %arg3[%c0_3, %c0_4] : memref<224x1xf32, #tpu.memory_space<vmem>>, vector<224x1xf32>
    %4 = vector.broadcast %3 : vector<224x1xf32> to vector<224x128xf32>
    %5 = arith.addf %2, %4 : vector<224x128xf32>
    %cst_5 = arith.constant 0.000000e+00 : f32
    %6 = vector.broadcast %cst_5 : f32 to vector<224x128xf32>
    %7 = arith.maximumf %5, %6 : vector<224x128xf32>
    %c0_6 = arith.constant 0 : index
    %c0_7 = arith.constant 0 : index
    %8 = vector.load %arg4[%c0_6, %c0_7] : memref<64x224xbf16, #tpu.memory_space<vmem>>, vector<64x224xbf16>
    %9 = arith.truncf %7 : vector<224x128xf32> to vector<224x128xbf16>
    %cst_8 = arith.constant dense<0.000000e+00> : vector<64x128xf32>
    %10 = tpu.matmul %8, %9, %cst_8 {dimension_numbers = #tpu.dot_dimension_numbers<[1], [0], [0], [1], [0, 0, 1, 1], [], []>} : vector<64x224xbf16>, vector<224x128xbf16>, vector<64x128xf32> -> vector<64x128xf32>
    %c0_9 = arith.constant 0 : index
    %c0_10 = arith.constant 0 : index
    %11 = vector.load %arg5[%c0_9, %c0_10] : memref<64x1xf32, #tpu.memory_space<vmem>>, vector<64x1xf32>
    %12 = vector.broadcast %11 : vector<64x1xf32> to vector<64x128xf32>
    %13 = arith.addf %10, %12 : vector<64x128xf32>
    %cst_11 = arith.constant 0.000000e+00 : f32
    %14 = vector.broadcast %cst_11 : f32 to vector<64x128xf32>
    %15 = arith.maximumf %13, %14 : vector<64x128xf32>
    %c0_12 = arith.constant 0 : index
    %c0_13 = arith.constant 0 : index
    %16 = vector.load %arg6[%c0_12, %c0_13] : memref<1x64xbf16, #tpu.memory_space<vmem>>, vector<1x64xbf16>
    %17 = arith.truncf %15 : vector<64x128xf32> to vector<64x128xbf16>
    %cst_14 = arith.constant dense<0.000000e+00> : vector<1x128xf32>
    %18 = tpu.matmul %16, %17, %cst_14 {dimension_numbers = #tpu.dot_dimension_numbers<[1], [0], [0], [1], [0, 0, 1, 1], [], []>} : vector<1x64xbf16>, vector<64x128xbf16>, vector<1x128xf32> -> vector<1x128xf32>
    %c0_15 = arith.constant 0 : index
    %c0_16 = arith.constant 0 : index
    %19 = vector.load %arg7[%c0_15, %c0_16] : memref<1x1xf32, #tpu.memory_space<vmem>>, vector<1x1xf32>
    %20 = vector.broadcast %19 : vector<1x1xf32> to vector<1x128xf32>
    %21 = arith.addf %18, %20 : vector<1x128xf32>
    %c0_17 = arith.constant 0 : index
    %c0_18 = arith.constant 0 : index
    %22 = vector.load %arg8[%c0_17, %c0_18] : memref<1x128xf32, #tpu.memory_space<vmem>>, vector<1x128xf32>
    tpu.vector_store %arg8[%c0_17, %c0_18], %21 {strides = array<i32>} : memref<1x128xf32, #tpu.memory_space<vmem>>, vector<1x128xf32>,
    return
  }
  func.func @transform_0(%arg0: i32) -> (i32, i32) {
    %c0_i32 = arith.constant 0 : i32
    %c0_i32_0 = arith.constant 0 : i32
    return %c0_i32, %arg0 : i32, i32
  }
  func.func @transform_1(%arg0: i32) -> (i32, i32) {
    %c0_i32 = arith.constant 0 : i32
    %c0_i32_0 = arith.constant 0 : i32
    %c0_i32_1 = arith.constant 0 : i32
    return %c0_i32, %c0_i32_0 : i32, i32
  }
  func.func @transform_2(%arg0: i32) -> (i32, i32) {
    %c0_i32 = arith.constant 0 : i32
    %c0_i32_0 = arith.constant 0 : i32
    %c0_i32_1 = arith.constant 0 : i32
    return %c0_i32, %c0_i32_0 : i32, i32
  }
  func.func @transform_3(%arg0: i32) -> (i32, i32) {
    %c0_i32 = arith.constant 0 : i32
    %c0_i32_0 = arith.constant 0 : i32
    %c0_i32_1 = arith.constant 0 : i32
    return %c0_i32, %c0_i32_0 : i32, i32
  }
  func.func @transform_4(%arg0: i32) -> (i32, i32) {
    %c0_i32 = arith.constant 0 : i32
    %c0_i32_0 = arith.constant 0 : i32
    %c0_i32_1 = arith.constant 0 : i32
    return %c0_i32, %c0_i32_0 : i32, i32
  }
  func.func @transform_5(%arg0: i32) -> (i32, i32) {
    %c0_i32 = arith.constant 0 : i32
    %c0_i32_0 = arith.constant 0 : i32
    %c0_i32_1 = arith.constant 0 : i32
    return %c0_i32, %c0_i32_0 : i32, i32
  }
  func.func @transform_6(%arg0: i32) -> (i32, i32) {
    %c0_i32 = arith.constant 0 : i32
    %c0_i32_0 = arith.constant 0 : i32
    %c0_i32_1 = arith.constant 0 : i32
    return %c0_i32, %c0_i32_0 : i32, i32
  }
  func.func @transform_7(%arg0: i32) -> (i32, i32) {
    %c0_i32 = arith.constant 0 : i32
    %c0_i32_0 = arith.constant 0 : i32
    return %c0_i32, %arg0 : i32, i32
  }
}

</mosaic_0001>

<bundles_post_ra>
// kernel: stock_predictor_forward.1
= control target key start
LH: loop header
LB: loop body
LE: loop exit
PB: predicated region body
PF: predicated region fallthrough
CT: control target
= control target key end

     0   :  { %vm345_vm0 = vcmask 1043456   ;;  %vm346_vm1 = vcmask 1044480   ;;  %vm302_vm2 = vcmask 72704   ;;  %v918_v2 = vmov 65535   ;;  %s1182_s0 = inlined_call_operand.vmem [shape: bf16[9,128], index: 0, kind: input, shape index: {}]   ;;  %s1183_s1 = inlined_call_operand.vmem [shape: bf16[224,9], index: 1, kind: input, shape index: {}]   ;;  %s1184_s6 = inlined_call_operand.<no memory space> [shape: f32[1,1], index: 6, kind: input, shape index: {}]   ;;  %s1185_s2 = inlined_call_operand.vmem [shape: f32[224,1], index: 2, kind: input, shape index: {}]   ;;  %s1186_s4 = inlined_call_operand.vmem [shape: f32[64,1], index: 4, kind: input, shape index: {}]   ;;  %s1187_s3 = inlined_call_operand.vmem [shape: bf16[64,224], index: 3, kind: input, shape index: {}]   ;;  %s1188_s5 = inlined_call_operand.vmem [shape: bf16[1,64], index: 5, kind: input, shape index: {}]   ;;  %s1189_s7 = inlined_call_operand.vmem [shape: f32[1,128], index: 7, kind: output, shape index: {}]  }
   0x1   :  { %v891_v0 = vld [vmem:[%s1182_s0] sm:$0x1f]   ;;  %v12_v1 = vstv %s1184_s6  ;;  %v347_v3 = vsel %vm345_vm0, 4294967295, %v918_v2  ;;  %v919_v7 = vmov 0   ;;  %v893_v8 = vld [vmem:[%s1183_s1 + $0x8] sm:$0xff]   ;;  %v894_v10 = vld [vmem:[%s1183_s1 + $0x10] sm:$0xff]  }
   0x2   :  { %v892_v4 = vld [vmem:[%s1183_s1] sm:$0xff]   ;;  %13 = vst [vmem:[#allocation2] sm:$0x1] %v12_v1  ;;  %v348_v5 = vsel %vm346_vm1, %v347_v3, 0  ;;  %889 = vset.pattern.permute.xlu0 %v919_v7  ;;  %890 = vset.pattern.permute.xlu1 %v919_v7  ;;  %v60_v11 = vld [vmem:[%s1185_s2 + $0x8] sm:$0xff]  ;;  %v61_v12 = vld [vmem:[%s1185_s2 + $0x10] sm:$0xff] }
   0x3   :  { %v350_v6 = vand.u32 %v891_v0, %v348_v5  ;;  %845 = vmatprep.mubr.msk.bf16.mxu0 %vm302_vm2, %v892_v4  ;;  %v59_v9 = vld [vmem:[%s1185_s2] sm:$0xff]  ;;  %644 = vmatprep.subr.bf16.mxu1 %v919_v7  ;;  %v62_v13 = vld [vmem:[%s1185_s2 + $0x18] sm:$0xff]  ;;  %v64_v16 = vld [vmem:[%s1185_s2 + $0x28] sm:$0xff]  ;;  %vm631_vm3 = vcmask 785408   ;;  %vm921_vm4 = vmmov 0   ;;  %vm732_vm5 = vcmask 523264  }
   0x4   :  { %89 = vperm.xlu0 %889, %v59_v9   ;;  %99 = vperm.xlu1 %890, %v61_v12   ;;  %v63_v14 = vld [vmem:[%s1185_s2 + $0x20] sm:$0xff]  ;;  %v895_v15 = vld [vmem:[%s1183_s1 + $0x18] sm:$0xff]   ;;  %v65_v18 = vld [vmem:[%s1185_s2 + $0x30] sm:$0xff] }
   0x5   :  { %843 = vmatprep.subr.bf16.mxu0 %v350_v6  ;;  %v896_v17 = vld [vmem:[%s1183_s1 + $0x20] sm:$0xff]   ;;  %v66_v19 = vld [vmem:[%s1185_s2 + $0x38] sm:$0xff]  ;;  %v897_v21 = vld [vmem:[%s1183_s1 + $0x28] sm:$0xff]  }
   0x6   :  { %844 = vmatpush3.bf16.msra.mxu0 %v350_v6  ;;  %v67_v20 = vld [vmem:[%s1185_s2 + $0x40] sm:$0xff]  ;;  %v68_v22 = vld [vmem:[%s1185_s2 + $0x48] sm:$0xff]  ;;  %v898_v23 = vld [vmem:[%s1183_s1 + $0x30] sm:$0xff]  }
   0x7   :  { %v69_v24 = vld [vmem:[%s1185_s2 + $0x50] sm:$0xff]  ;;  %v70_v25 = vld [vmem:[%s1185_s2 + $0x58] sm:$0xff]  ;;  %v71_v26 = vld [vmem:[%s1185_s2 + $0x60] sm:$0xff] }
   0x8   :  { %94 = vperm.xlu0 %889, %v60_v11   ;;  %104 = vperm.xlu1 %890, %v62_v13   ;;  %v899_v27 = vld [vmem:[%s1183_s1 + $0x38] sm:$0xff]   ;;  %v72_v28 = vld [vmem:[%s1185_s2 + $0x68] sm:$0xff]  ;;  %v900_v29 = vld [vmem:[%s1183_s1 + $0x40] sm:$0xff]  }
   0x9   :  { %846 = vmatmul.mubr.msk.bf16.vlgmr.msra.gmra.mrb[0].mxu0 %vm302_vm2, %v893_v8  ;;  %v73_v30 = vld [vmem:[%s1185_s2 + $0x70] sm:$0xff]  ;;  %v74_v31 = vld [vmem:[%s1185_s2 + $0x78] sm:$0xff]  ;;  %v75_v32 = vld [vmem:[%s1185_s2 + $0x80] sm:$0xff] }
   0xa   :  { %849 = vmatprep.mubr.msk.bf16.mxu0 %vm302_vm2, %v894_v10  ;;  %v901_v33 = vld [vmem:[%s1183_s1 + $0x48] sm:$0xff]   ;;  %v902_v35 = vld [vmem:[%s1183_s1 + $0x50] sm:$0xff]   ;;  %v78_v37 = vld [vmem:[%s1185_s2 + $0x98] sm:$0xff] }
   0xb   :  { %v76_v34 = vld [vmem:[%s1185_s2 + $0x88] sm:$0xff]  ;;  %v77_v36 = vld [vmem:[%s1185_s2 + $0x90] sm:$0xff]  ;;  %v79_v38 = vld [vmem:[%s1185_s2 + $0xa0] sm:$0xff] }
   0xc   :  { %109 = vperm.xlu0 %889, %v63_v14   ;;  %114 = vperm.xlu1 %890, %v64_v16   ;;  %v903_v39 = vld [vmem:[%s1183_s1 + $0x58] sm:$0xff]   ;;  %v80_v40 = vld [vmem:[%s1185_s2 + $0xa8] sm:$0xff]  ;;  %v904_v41 = vld [vmem:[%s1183_s1 + $0x60] sm:$0xff]  }
   0xd   :  { %v81_v42 = vld [vmem:[%s1185_s2 + $0xb0] sm:$0xff]  ;;  %v82_v43 = vld [vmem:[%s1185_s2 + $0xb8] sm:$0xff]  ;;  %v83_v44 = vld [vmem:[%s1185_s2 + $0xc0] sm:$0xff] }
   0xe   :  { %v905_v45 = vld [vmem:[%s1183_s1 + $0x68] sm:$0xff]   ;;  %v85_v47 = vld [vmem:[%s1185_s2 + $0xd0] sm:$0xff]  ;;  %v86_v48 = vld [vmem:[%s1185_s2 + $0xd8] sm:$0xff] }
   0xf   :  { %v84_v46 = vld [vmem:[%s1185_s2 + $0xc8] sm:$0xff]  ;;  %v547_v49 = vld [vmem:[%s1186_s4] sm:$0xff]  ;;  %v549_v51 = vld [vmem:[%s1186_s4 + $0x10] sm:$0xff] }
  0x10   :  { %119 = vperm.xlu0 %889, %v65_v18   ;;  %124 = vperm.xlu1 %890, %v66_v19   ;;  %v548_v50 = vld [vmem:[%s1186_s4 + $0x8] sm:$0xff]  ;;  %v550_v52 = vld [vmem:[%s1186_s4 + $0x18] sm:$0xff]  ;;  %v551_v53 = vld [vmem:[%s1186_s4 + $0x20] sm:$0xff] }
  0x11   :  { %850 = vmatmul.mubr.msk.bf16.gmra.mrb[4].mxu0 %vm302_vm2, %v895_v15  ;;  %v552_v54 = vld [vmem:[%s1186_s4 + $0x28] sm:$0xff]  ;;  %v553_v55 = vld [vmem:[%s1186_s4 + $0x30] sm:$0xff]  ;;  %v554_v56 = vld [vmem:[%s1186_s4 + $0x38] sm:$0xff] }
  0x12   :  { %853 = vmatprep.mubr.msk.bf16.mxu0 %vm302_vm2, %v896_v17  ;;  %v722_v57 = vld [vmem:[#allocation2] sm:$0x1]  ;;  %v908_v58 = vld [vmem:[%s1187_s3 + $0x4] ss:$8 sps:$4 sm:$0xff]  }
  0x13   :  { %818 = vmatprep.mubr.msk.bf16.mxu1 %vm631_vm3, %v908_v58 }
  0x14   :  { %129 = vperm.xlu0 %889, %v67_v20   ;;  %134 = vperm.xlu1 %890, %v68_v22  }
  0x18   :  { %139 = vperm.xlu0 %889, %v69_v24   ;;  %144 = vperm.xlu1 %890, %v70_v25  }
  0x19   :  { %854 = vmatmul.mubr.msk.bf16.gmra.mrb[8].mxu0 %vm302_vm2, %v897_v21 }
  0x1a   :  { %857 = vmatprep.mubr.msk.bf16.mxu0 %vm302_vm2, %v898_v23 }
  0x1c   :  { %149 = vperm.xlu0 %889, %v71_v26   ;;  %154 = vperm.xlu1 %890, %v72_v28  }
  0x20   :  { %159 = vperm.xlu0 %889, %v73_v30   ;;  %164 = vperm.xlu1 %890, %v74_v31  }
  0x21   :  { %858 = vmatmul.mubr.msk.bf16.gmra.mrb[12].mxu0 %vm302_vm2, %v899_v27 }
  0x22   :  { %861 = vmatprep.mubr.msk.bf16.mxu0 %vm302_vm2, %v900_v29 }
  0x24   :  { %169 = vperm.xlu0 %889, %v75_v32   ;;  %174 = vperm.xlu1 %890, %v76_v34  }
  0x28   :  { %179 = vperm.xlu0 %889, %v77_v36   ;;  %184 = vperm.xlu1 %890, %v78_v37  }
  0x29   :  { %862 = vmatmul.mubr.msk.bf16.gmra.mrb[16].mxu0 %vm302_vm2, %v901_v33 }
  0x2a   :  { %865 = vmatprep.mubr.msk.bf16.mxu0 %vm302_vm2, %v902_v35 }
  0x2c   :  { %189 = vperm.xlu0 %889, %v79_v38   ;;  %194 = vperm.xlu1 %890, %v80_v40  }
  0x30   :  { %199 = vperm.xlu0 %889, %v81_v42   ;;  %204 = vperm.xlu1 %890, %v82_v43  }
  0x31   :  { %866 = vmatmul.mubr.msk.bf16.gmra.mrb[20].mxu0 %vm302_vm2, %v903_v39 }
  0x32   :  { %869 = vmatprep.mubr.msk.bf16.mxu0 %vm302_vm2, %v904_v41 }
  0x34   :  { %209 = vperm.xlu0 %889, %v83_v44   ;;  %214 = vperm.xlu1 %890, %v84_v46  }
  0x38   :  { %219 = vperm.xlu0 %889, %v85_v47   ;;  %224 = vperm.xlu1 %890, %v86_v48  }
  0x39   :  { %870 = vmatmul.mubr.msk.bf16.gmra.mrb[24].mxu0 %vm302_vm2, %v905_v45 }
  0x3c   :  { %557 = vperm.xlu0 %889, %v547_v49   ;;  %562 = vperm.xlu1 %890, %v548_v50  }
  0x40   :  { %567 = vperm.xlu0 %889, %v549_v51   ;;  %572 = vperm.xlu1 %890, %v550_v52  }
  0x44   :  { %577 = vperm.xlu0 %889, %v551_v53   ;;  %582 = vperm.xlu1 %890, %v552_v54  }
  0x48   :  { %587 = vperm.xlu0 %889, %v553_v55   ;;  %592 = vperm.xlu1 %890, %v554_v56  }
  0x4c   :  { %725 = vperm.xlu0 %889, %v722_v57  }
  0x83   :  { %v90_v59 = vpop.permute.xlu0 %89  ;;  %v100_v60 = vpop.permute.xlu1 %99 }
  0x87   :  { %v95_v61 = vpop.permute.xlu0 %94  ;;  %v105_v62 = vpop.permute.xlu1 %104 }
  0x8b   :  { %v110_v63 = vpop.permute.xlu0 %109  ;;  %v115_v0 = vpop.permute.xlu1 %114 }
  0x8f   :  { %v120_v1 = vpop.permute.xlu0 %119  ;;  %v125_v2 = vpop.permute.xlu1 %124 }
  0x93   :  { %v130_v3 = vpop.permute.xlu0 %129  ;;  %v135_v4 = vpop.permute.xlu1 %134 }
  0x97   :  { %v140_v5 = vpop.permute.xlu0 %139  ;;  %v145_v10 = vpop.permute.xlu1 %144 }
  0x9b   :  { %v150_v18 = vpop.permute.xlu0 %149  ;;  %v155_v22 = vpop.permute.xlu1 %154 }
  0x9f   :  { %v160_v31 = vpop.permute.xlu0 %159  ;;  %v165_v35 = vpop.permute.xlu1 %164 }
  0xa3   :  { %v170_v43 = vpop.permute.xlu0 %169  ;;  %v175_v48 = vpop.permute.xlu1 %174 }
  0xa7   :  { %v180_v55 = vpop.permute.xlu0 %179 }
  0xdc   :  { %v847_v6 = vpop.f32.mrb[0].mxu0 }
  0xdd   :  { %v395_v8 = vadd.f32 %v847_v6, %v100_v60  ;;  %v386_v9 = vpop.f32.mrb[1].mxu0  ;;  %v185_v60 = vpop.permute.xlu1 %184 }
  0xde   :  { %v387_v11 = vadd.f32 %v386_v9, %v90_v59  ;;  %v848_v12 = vpop.f32.mrb[2].mxu0 }
  0xdf   :  { %v398_v13 = vadd.f32 %v848_v12, %v105_v62  ;;  %v389_v14 = vpop.f32.mrb[3].mxu0  ;;  %v499_v16 = vmax.f32 %v395_v8, 0.0 }
  0xe0   :  { %v390_v15 = vadd.f32 %v389_v14, %v95_v61  ;;  %v497_v19 = vmax.f32 %v387_v11, 0.0 }
  0xe1   :  { %v500_v17 = vmax.f32 %v398_v13, 0.0  ;;  %v195_v9 = vpop.permute.xlu1 %194 }
  0xe2   :  { %v498_v20 = vmax.f32 %v390_v15, 0.0 }
  0xe3   :  { %v534_v21 = vpack.c.bf16 %v500_v17, %v499_v16 }
  0xe4   :  { %v851_v23 = vpop.f32.mrb[4].mxu0  ;;  %v533_v24 = vpack.c.bf16 %v498_v20, %v497_v19 }
  0xe5   :  { %v411_v25 = vadd.f32 %v851_v23, %v120_v1  ;;  %v402_v26 = vpop.f32.mrb[5].mxu0 }
  0xe6   :  { %v403_v27 = vadd.f32 %v402_v26, %v110_v63  ;;  %v852_v28 = vpop.f32.mrb[6].mxu0  ;;  %645 = vmatpush1.bf16.msra.mxu1 %v533_v24 }
  0xe7   :  { %v414_v29 = vadd.f32 %v852_v28, %v125_v2  ;;  %v405_v30 = vpop.f32.mrb[7].mxu0  ;;  %646 = vmatprep.subr.bf16.mxu1 %v919_v7  ;;  %v503_v33 = vmax.f32 %v411_v25, 0.0 }
  0xe8   :  { %v406_v32 = vadd.f32 %v405_v30, %v115_v0  ;;  %v501_v36 = vmax.f32 %v403_v27, 0.0 }
  0xe9   :  { %v504_v34 = vmax.f32 %v414_v29, 0.0 }
  0xea   :  { %v502_v37 = vmax.f32 %v406_v32, 0.0  ;;  %647 = vmatpush1.bf16.msra.mxu1 %v534_v21 }
  0xeb   :  { %v536_v38 = vpack.c.bf16 %v504_v34, %v503_v33  ;;  %648 = vmatprep.subr.bf16.mxu1 %v919_v7 }
  0xec   :  { %v535_v39 = vpack.c.bf16 %v502_v37, %v501_v36  ;;  %v855_v40 = vpop.f32.mrb[8].mxu0 }
  0xed   :  { %v427_v41 = vadd.f32 %v855_v40, %v140_v5  ;;  %v418_v42 = vpop.f32.mrb[9].mxu0 }
  0xee   :  { %v419_v44 = vadd.f32 %v418_v42, %v130_v3  ;;  %v856_v45 = vpop.f32.mrb[10].mxu0  ;;  %649 = vmatpush1.bf16.msra.mxu1 %v535_v39 }
  0xef   :  { %v430_v46 = vadd.f32 %v856_v45, %v145_v10  ;;  %v421_v47 = vpop.f32.mrb[11].mxu0  ;;  %650 = vmatprep.subr.bf16.mxu1 %v919_v7  ;;  %v507_v50 = vmax.f32 %v427_v41, 0.0 }
  0xf0   :  { %v422_v49 = vadd.f32 %v421_v47, %v135_v4  ;;  %v505_v52 = vmax.f32 %v419_v44, 0.0  ;;  %v190_v4 = vpop.permute.xlu0 %189 }
  0xf1   :  { %v508_v51 = vmax.f32 %v430_v46, 0.0 }
  0xf2   :  { %v506_v53 = vmax.f32 %v422_v49, 0.0  ;;  %651 = vmatpush1.bf16.msra.mxu1 %v536_v38 }
  0xf3   :  { %v538_v54 = vpack.c.bf16 %v508_v51, %v507_v50  ;;  %652 = vmatprep.subr.bf16.mxu1 %v919_v7 }
  0xf4   :  { %v537_v56 = vpack.c.bf16 %v506_v53, %v505_v52  ;;  %v859_v57 = vpop.f32.mrb[12].mxu0 }
  0xf5   :  { %v443_v58 = vadd.f32 %v859_v57, %v160_v31  ;;  %v434_v59 = vpop.f32.mrb[13].mxu0 }
  0xf6   :  { %v435_v61 = vadd.f32 %v434_v59, %v150_v18  ;;  %v860_v62 = vpop.f32.mrb[14].mxu0  ;;  %653 = vmatpush1.bf16.msra.mxu1 %v537_v56  ;;  %v200_v18 = vpop.permute.xlu0 %199  ;;  %v906_v59 = vld [vmem:[%s1187_s3] ss:$8 sps:$4 sm:$0xff]  }
  0xf7   :  { %v446_v63 = vadd.f32 %v860_v62, %v165_v35  ;;  %v437_v0 = vpop.f32.mrb[15].mxu0  ;;  %654 = vmatprep.subr.bf16.mxu1 %v919_v7  ;;  %v511_v2 = vmax.f32 %v443_v58, 0.0  ;;  %v914_v62 = vld [vmem:[%s1187_s3 + $0x20] ss:$8 sps:$4 sm:$0xff]  }
  0xf8   :  { %v438_v1 = vadd.f32 %v437_v0, %v155_v22  ;;  %v509_v5 = vmax.f32 %v435_v61, 0.0  ;;  %v205_v22 = vpop.permute.xlu1 %204  ;;  %v911_v61 = vld [vmem:[%s1187_s3 + $0x10] ss:$8 sps:$4 sm:$0xff]  }
  0xf9   :  { %v512_v3 = vmax.f32 %v446_v63, 0.0  ;;  %v915_v63 = vld [vmem:[%s1187_s3 + $0x34] ss:$8 sps:$4 sm:$0xff]   ;;  %v917_v0 = vld [vmem:[%s1187_s3 + $0x30] ss:$8 sps:$4 sm:$0xff]  }
  0xfa   :  { %v510_v6 = vmax.f32 %v438_v1, 0.0  ;;  %655 = vmatpush1.bf16.msra.mxu1 %v538_v54  ;;  %v210_v30 = vpop.permute.xlu0 %209  ;;  %v920_v1 = vmov 0.0  }
  0xfb   :  { %v540_v8 = vpack.c.bf16 %v512_v3, %v511_v2  ;;  %656 = vmatprep.subr.bf16.mxu1 %v919_v7  ;;  %873 = vmatprep.subr.bf16.mxu0 %v920_v1 }
  0xfc   :  { %v539_v10 = vpack.c.bf16 %v510_v6, %v509_v5  ;;  %v863_v11 = vpop.f32.mrb[16].mxu0  ;;  %v215_v35 = vpop.permute.xlu1 %214  ;;  %881 = vmatprep.mubr.msk.bf16.mxu0 %vm921_vm4, %v920_v1 }
  0xfd   :  { %v459_v12 = vadd.f32 %v863_v11, %v180_v55  ;;  %v450_v13 = vpop.f32.mrb[17].mxu0 }
  0xfe   :  { %v451_v14 = vadd.f32 %v450_v13, %v170_v43  ;;  %v864_v15 = vpop.f32.mrb[18].mxu0  ;;  %657 = vmatpush1.bf16.msra.mxu1 %v539_v10  ;;  %v220_v42 = vpop.permute.xlu0 %219 }
  0xff   :  { %v462_v16 = vadd.f32 %v864_v15, %v185_v60  ;;  %v453_v17 = vpop.f32.mrb[19].mxu0  ;;  %658 = vmatprep.subr.bf16.mxu1 %v919_v7  ;;  %v515_v20 = vmax.f32 %v459_v12, 0.0  ;;  %v909_v60 = vld [vmem:[%s1187_s3 + $0x14] ss:$8 sps:$4 sm:$0xff]  }
 0x100   :  { %v454_v19 = vadd.f32 %v453_v17, %v175_v48  ;;  %v513_v23 = vmax.f32 %v451_v14, 0.0  ;;  %v225_v47 = vpop.permute.xlu1 %224 }
 0x101   :  { %v516_v21 = vmax.f32 %v462_v16, 0.0 }
 0x102   :  { %v514_v24 = vmax.f32 %v454_v19, 0.0  ;;  %659 = vmatpush1.bf16.msra.mxu1 %v540_v8  ;;  %v558_v2 = vpop.permute.xlu0 %557 }
 0x103   :  { %v542_v25 = vpack.c.bf16 %v516_v21, %v515_v20  ;;  %660 = vmatprep.subr.bf16.mxu1 %v919_v7 }
 0x104   :  { %v541_v26 = vpack.c.bf16 %v514_v24, %v513_v23  ;;  %v867_v27 = vpop.f32.mrb[20].mxu0  ;;  %v563_v6 = vpop.permute.xlu1 %562 }
 0x105   :  { %v475_v28 = vadd.f32 %v867_v27, %v200_v18  ;;  %v466_v29 = vpop.f32.mrb[21].mxu0 }
 0x106   :  { %v467_v31 = vadd.f32 %v466_v29, %v190_v4  ;;  %v868_v32 = vpop.f32.mrb[22].mxu0  ;;  %661 = vmatpush1.bf16.msra.mxu1 %v541_v26  ;;  %v568_v14 = vpop.permute.xlu0 %567 }
 0x107   :  { %v478_v33 = vadd.f32 %v868_v32, %v205_v22  ;;  %v469_v34 = vpop.f32.mrb[23].mxu0  ;;  %662 = vmatprep.subr.bf16.mxu1 %v919_v7  ;;  %v519_v37 = vmax.f32 %v475_v28, 0.0 }
 0x108   :  { %v470_v36 = vadd.f32 %v469_v34, %v195_v9  ;;  %v517_v39 = vmax.f32 %v467_v31, 0.0  ;;  %v573_v18 = vpop.permute.xlu1 %572 }
 0x109   :  { %v520_v38 = vmax.f32 %v478_v33, 0.0 }
 0x10a   :  { %v518_v40 = vmax.f32 %v470_v36, 0.0  ;;  %663 = vmatpush1.bf16.msra.mxu1 %v542_v25  ;;  %v578_v25 = vpop.permute.xlu0 %577 }
 0x10b   :  { %v544_v41 = vpack.c.bf16 %v520_v38, %v519_v37  ;;  %664 = vmatprep.subr.bf16.mxu1 %v919_v7 }
 0x10c   :  { %v543_v43 = vpack.c.bf16 %v518_v40, %v517_v39  ;;  %v871_v44 = vpop.f32.mrb[24].mxu0  ;;  %v583_v29 = vpop.permute.xlu1 %582 }
 0x10d   :  { %v491_v45 = vadd.f32 %v871_v44, %v220_v42  ;;  %v482_v46 = vpop.f32.mrb[25].mxu0 }
 0x10e   :  { %v483_v48 = vadd.f32 %v482_v46, %v210_v30  ;;  %v872_v49 = vpop.f32.mrb[26].mxu0  ;;  %665 = vmatpush1.bf16.msra.mxu1 %v543_v43  ;;  %v588_v36 = vpop.permute.xlu0 %587 }
 0x10f   :  { %v494_v50 = vadd.f32 %v872_v49, %v225_v47  ;;  %v485_v51 = vpop.f32.mrb[27].mxu0  ;;  %666 = vmatprep.subr.bf16.mxu1 %v919_v7  ;;  %v523_v53 = vmax.f32 %v491_v45, 0.0  ;;  %v717_v47 = vld [vmem:[%s1188_s5] sm:$0x1] }
 0x110   :  { %v486_v52 = vadd.f32 %v485_v51, %v215_v35  ;;  %v521_v55 = vmax.f32 %v483_v48, 0.0  ;;  %v593_v40 = vpop.permute.xlu1 %592  ;;  %v728_v48 = vlaneseq }
 0x111   :  { %v524_v54 = vmax.f32 %v494_v50, 0.0 }
 0x112   :  { %v522_v56 = vmax.f32 %v486_v52, 0.0  ;;  %667 = vmatpush1.bf16.msra.mxu1 %v544_v41  ;;  %v729_v49 = vshrl.u32 %v728_v48, 7  ;;  %v726_v51 = vpop.permute.xlu0 %725 }
 0x113   :  { %v546_v57 = vpack.c.bf16 %v524_v54, %v523_v53  ;;  %668 = vmatprep.subr.bf16.mxu1 %v919_v7 }
 0x114   :  { %v545_v58 = vpack.c.bf16 %v522_v56, %v521_v55  ;;  %v730_v50 = vsub.s32 0, %v729_v49 }
 0x116   :  { %669 = vmatpush1.bf16.msra.mxu1 %v545_v58  ;;  %v731_v52 = vrot.slane %v726_v51, %v730_v50 }
 0x117   :  { %670 = vmatprep.subr.bf16.mxu1 %v919_v7  ;;  %v912_v7 = vld [vmem:[%s1187_s3 + $0x24] ss:$8 sps:$4 sm:$0xff]  }
 0x11a   :  { %671 = vmatpush1.bf16.msra.mxu1 %v546_v57 }
 0x11d   :  { %677 = vmatmul.mubr.bf16.vlgmr.msra.gmra.mrb[0].mxu1 %v906_v59 }
 0x11e   :  { %819 = vmatprep.mubr.msk.bf16.mxu1 %vm631_vm3, %v909_v60 }
 0x125   :  { %685 = vmatmul.mubr.bf16.gmra.mrb[4].mxu1 %v911_v61 }
 0x126   :  { %820 = vmatprep.mubr.msk.bf16.mxu1 %vm631_vm3, %v912_v7 }
 0x12d   :  { %693 = vmatmul.mubr.bf16.gmra.mrb[8].mxu1 %v914_v62 }
 0x12e   :  { %821 = vmatprep.mubr.msk.bf16.mxu1 %vm631_vm3, %v915_v63 }
 0x135   :  { %701 = vmatmul.mubr.bf16.gmra.mrb[12].mxu1 %v917_v0 }
 0x1f0   :  { %v678_v3 = vpop.f32.mrb[0].mxu1 }
 0x1f1   :  { %v679_v4 = vadd.f32 %v678_v3, %v558_v2  ;;  %v680_v5 = vpop.f32.mrb[1].mxu1 }
 0x1f2   :  { %v681_v8 = vpop.f32.mrb[2].mxu1 }
 0x1f3   :  { %v682_v9 = vadd.f32 %v681_v8, %v563_v6  ;;  %v683_v10 = vpop.f32.mrb[3].mxu1  ;;  %v709_v11 = vmax.f32 %v679_v4, 0.0 }
 0x1f5   :  { %v710_v12 = vmax.f32 %v682_v9, 0.0 }
 0x1f7   :  { %v718_v13 = vpack.c.bf16 %v710_v12, %v709_v11 }
 0x1f8   :  { %v686_v15 = vpop.f32.mrb[4].mxu1 }
 0x1f9   :  { %v687_v16 = vadd.f32 %v686_v15, %v568_v14  ;;  %v688_v17 = vpop.f32.mrb[5].mxu1  ;;  %874 = vmatpush3.bf16.msra.mxu0 %v718_v13 }
 0x1fa   :  { %v689_v19 = vpop.f32.mrb[6].mxu1  ;;  %875 = vmatprep.subr.bf16.mxu0 %v920_v1 }
 0x1fb   :  { %v690_v20 = vadd.f32 %v689_v19, %v573_v18  ;;  %v691_v21 = vpop.f32.mrb[7].mxu1  ;;  %v711_v22 = vmax.f32 %v687_v16, 0.0 }
 0x1fd   :  { %v712_v23 = vmax.f32 %v690_v20, 0.0 }
 0x1ff   :  { %v719_v24 = vpack.c.bf16 %v712_v23, %v711_v22 }
 0x200   :  { %v694_v26 = vpop.f32.mrb[8].mxu1 }
 0x201   :  { %v695_v27 = vadd.f32 %v694_v26, %v578_v25  ;;  %v696_v28 = vpop.f32.mrb[9].mxu1  ;;  %876 = vmatpush3.bf16.msra.mxu0 %v719_v24 }
 0x202   :  { %v697_v30 = vpop.f32.mrb[10].mxu1  ;;  %877 = vmatprep.subr.bf16.mxu0 %v920_v1 }
 0x203   :  { %v698_v31 = vadd.f32 %v697_v30, %v583_v29  ;;  %v699_v32 = vpop.f32.mrb[11].mxu1  ;;  %v713_v33 = vmax.f32 %v695_v27, 0.0 }
 0x205   :  { %v714_v34 = vmax.f32 %v698_v31, 0.0 }
 0x207   :  { %v720_v35 = vpack.c.bf16 %v714_v34, %v713_v33 }
 0x208   :  { %v702_v37 = vpop.f32.mrb[12].mxu1 }
 0x209   :  { %v703_v38 = vadd.f32 %v702_v37, %v588_v36  ;;  %v704_v39 = vpop.f32.mrb[13].mxu1  ;;  %878 = vmatpush3.bf16.msra.mxu0 %v720_v35 }
 0x20a   :  { %v705_v41 = vpop.f32.mrb[14].mxu1  ;;  %879 = vmatprep.subr.bf16.mxu0 %v920_v1 }
 0x20b   :  { %v706_v42 = vadd.f32 %v705_v41, %v593_v40  ;;  %v707_v43 = vpop.f32.mrb[15].mxu1  ;;  %v715_v44 = vmax.f32 %v703_v38, 0.0 }
 0x20d   :  { %v716_v45 = vmax.f32 %v706_v42, 0.0 }
 0x20f   :  { %v721_v46 = vpack.c.bf16 %v716_v45, %v715_v44 }
 0x211   :  { %880 = vmatpush3.bf16.msra.mxu0 %v721_v46 }
 0x214   :  { %882 = vmatmul.mubr.msk.bf16.vlgmr.msra.gmra.mrb[28].mxu0 %vm732_vm5, %v717_v47 }
 0x2e7   :  { %v770_v53 = vpop.f32.mrb[28].mxu0 }
 0x2e8   :  { %v771_v54 = vadd.f32 %v770_v53, %v731_v52  ;;  %v883_v55 = vpop.f32.mrb[29].mxu0 }
 0x2e9   :  { %v773_v56 = vpop.f32.mrb[30].mxu0 }
 0x2ea   :  { %776 = vst [vmem:[%s1189_s7] sm:$0x1] %v771_v54  ;;  %v884_v57 = vpop.f32.mrb[31].mxu0 }

</bundles_post_ra>
